<compile_context>
chip_gen: v7x
topology: tpu7x:2x2x1
jax: 0.10.0
libtpu: 0.0.40
codegen_flags: <defaults>
</compile_context>

<pallas_src>
import math

import jax
import jax.numpy as jnp
from jax.experimental import pallas as pl
from jax.experimental.pallas import tpu as pltpu


# ------------------------------------------------------------------ in-kernel helpers

def _emit_stats(st_ref, h):
    """Write per-tile partial BN stats into an (8, C) block: row 0 = sum, row 1 = sum-of-squares."""
    c = h.shape[-1]
    st_ref[pl.ds(0, 1), :] = jnp.sum(h, axis=0, keepdims=True)
    st_ref[pl.ds(1, 1), :] = jnp.sum(h * h, axis=0, keepdims=True)
    st_ref[pl.ds(2, 6), :] = jnp.zeros((6, c), jnp.float32)


# ------------------------------------------------------------------ kernels

def _mm_stats_kernel(x_ref, w_ref, o_ref, st_ref):
    # (tm, K) @ (K, Cp) -> bf16 (tm, Cp), plus per-tile partial BN stats from the f32 accumulator.
    h = jnp.dot(x_ref[...], w_ref[...], preferred_element_type=jnp.float32)
    o_ref[...] = h.astype(o_ref.dtype)
    _emit_stats(st_ref, h)


def _bn_relu_mm_stats_kernel(h_ref, sc_ref, sh_ref, w_ref, o_ref, st_ref):
    # BN-apply + ReLU prologue (f32 math on bf16 input), (tm, Cp) @ (Cp, Cp') matmul,
    # per-tile partial BN stats of the f32 output.
    y = jnp.maximum(h_ref[...].astype(jnp.float32) * sc_ref[...] + sh_ref[...], 0.0)
    h = jnp.dot(y.astype(jnp.bfloat16), w_ref[...], preferred_element_type=jnp.float32)
    o_ref[...] = h.astype(o_ref.dtype)
    _emit_stats(st_ref, h)


def _conv3x3_bn_stats_kernel(h_ref, sc_ref, sh_ref, w_ref, b_ref,
                             o_ref, st_ref, yp_ref):
    # h_ref: (1, H, W, Cp) bf16 pre-BN activations of C1.
    # Prologue: y = relu(bn1(h)) in f32, stored bf16 into a halo VMEM scratch whose border is
    #           zeroed every step (safe with a 'parallel' batch axis on v7x).
    # Conv:     3 row-group matmuls (K = 3*Cp) accumulated in f32 -- no 9x im2col patch.
    # Epilogue: bf16 pre-BN2 output + per-image partial BN stats from the f32 accumulator.
    H, W, C = o_ref.shape[1], o_ref.shape[2], o_ref.shape[3]

    y = jnp.maximum(h_ref[0].astype(jnp.float32) * sc_ref[...] + sh_ref[...], 0.0)
    yp_ref[pl.ds(1, H), pl.ds(1, W), :] = y.astype(yp_ref.dtype)
    # Zero only the halo border (2 rows + 2 columns) each step -- a few KB of VPU work.
    zrow = jnp.zeros((1, W + 2, C), yp_ref.dtype)
    yp_ref[pl.ds(0, 1), :, :] = zrow
    yp_ref[pl.ds(H + 1, 1), :, :] = zrow
    zcol = jnp.zeros((H, 1, C), yp_ref.dtype)
    yp_ref[pl.ds(1, H), pl.ds(0, 1), :] = zcol
    yp_ref[pl.ds(1, H), pl.ds(W + 1, 1), :] = zcol

    acc = jnp.zeros((H * W, C), jnp.float32)
    for dy in range(3):                                   # 3 groups, K = 3*C per matmul
        patch = jnp.concatenate(
            [yp_ref[pl.ds(dy, H), pl.ds(dx, W), :] for dx in range(3)],
            axis=-1).reshape(H * W, 3 * C)                # (H*W, 3*Cp) bf16
        acc = acc + jnp.dot(patch, w_ref[pl.ds(dy * 3 * C, 3 * C), :],
                            preferred_element_type=jnp.float32)
    acc = acc + b_ref[...]                                # conv bias (C2 has bias)

    o_ref[0] = acc.reshape(H, W, C).astype(o_ref.dtype)
    _emit_stats(st_ref, acc)


def _stats_kernel(x_ref, st_ref):
    # Standalone partial-stats reduction (only used on the subsampled stride-2 conv output).
    _emit_stats(st_ref, x_ref[...].astype(jnp.float32))


def _bn_add_relu_kernel(h_ref, sc_ref, sh_ref, r_ref, o_ref):
    # Final stage, identity shortcut: relu(bn3(h3) + x).
    bnv = h_ref[...].astype(jnp.float32) * sc_ref[...] + sh_ref[...]
    o_ref[...] = jnp.maximum(bnv + r_ref[...].astype(jnp.float32), 0.0)


def _bn_mm_shortcut_relu_kernel(h_ref, sc_ref, sh_ref, x_ref, w_ref, o_ref):
    # Final stage, 1x1 shortcut fused: relu(bn3(h3) + x_strided @ w_sc).
    short = jnp.dot(x_ref[...], w_ref[...], preferred_element_type=jnp.float32)
    bnv = h_ref[...].astype(jnp.float32) * sc_ref[...] + sh_ref[...]
    o_ref[...] = jnp.maximum(bnv + short, 0.0)


# ------------------------------------------------------------------ wrappers

def _pad_to_128(c):
    return max(128, ((c + 127) // 128) * 128)


def _tile_m(M, cap=512):
    # Largest row tile <= cap dividing M, preferring >=2 grid steps (keeps both v7x cores busy).
    cands = (1024, 512, 256, 128, 64, 32, 16, 8)
    for t in cands:
        if t <= cap and M % t == 0 and M // t >= 2:
            return t
    for t in cands:
        if t <= cap and M % t == 0:
            return t
    return M  # TODO(synk): handle ragged M via pl.cdiv + masking for awkward shapes.


def _combine_stats(st, c):
    """Combine per-tile partial stats (mt*8, C) -> (sum, sumsq) as (C,) f32 vectors."""
    st3 = st.reshape(-1, 8, c)
    return st3[:, 0, :].sum(axis=0), st3[:, 1, :].sum(axis=0)


def bn_scale_shift(s, q, count, gamma, beta, eps=1e-5):
    """Per-channel scale/shift from batch statistics (tiny (C,) jnp math in the wrapper)."""
    mean = s / count
    var = jnp.maximum(q / count - mean * mean, 0.0)   # guard tiny negative from cancellation
    scale = gamma / jnp.sqrt(var + eps)
    shift = beta - mean * scale
    return scale[None, :], shift[None, :]             # (1, C) each


def matmul_stats(x2d, w):
    M, K = x2d.shape
    C = w.shape[1]
    tm = _tile_m(M)
    mt = M // tm
    return pl.pallas_call(
        _mm_stats_kernel,
        out_shape=(jax.ShapeDtypeStruct((M, C), jnp.bfloat16),
                   jax.ShapeDtypeStruct((mt * 8, C), jnp.float32)),
        grid=(mt,),
        in_specs=[pl.BlockSpec((tm, K), lambda i: (i, 0)),
                  pl.BlockSpec((K, C), lambda i: (0, 0))],
        out_specs=(pl.BlockSpec((tm, C), lambda i: (i, 0)),
                   pl.BlockSpec((8, C), lambda i: (i, 0))),
        compiler_params=pltpu.CompilerParams(
            dimension_semantics=("parallel",)),        # per-tile partial stats -> fully parallel
    )(x2d, w)


def bn_relu_matmul_stats(x2d, sc, sh, w):
    M, K = x2d.shape
    C = w.shape[1]
    tm = _tile_m(M)
    mt = M // tm
    return pl.pallas_call(
        _bn_relu_mm_stats_kernel,
        out_shape=(jax.ShapeDtypeStruct((M, C), jnp.bfloat16),
                   jax.ShapeDtypeStruct((mt * 8, C), jnp.float32)),
        grid=(mt,),
        in_specs=[pl.BlockSpec((tm, K), lambda i: (i, 0)),
                  pl.BlockSpec((1, K), lambda i: (0, 0)),
                  pl.BlockSpec((1, K), lambda i: (0, 0)),
                  pl.BlockSpec((K, C), lambda i: (0, 0))],
        out_specs=(pl.BlockSpec((tm, C), lambda i: (i, 0)),
                   pl.BlockSpec((8, C), lambda i: (i, 0))),
        compiler_params=pltpu.CompilerParams(
            dimension_semantics=("parallel",)),
    )(x2d, sc, sh, w)


def conv3x3_bn_relu_stats(h1n, sc1, sh1, w2p, b2):
    # TODO(synk): for very large H*W, row-tile the conv (8-16 output rows + 2 halo rows per
    #             grid step); with bf16 blocks and row-group matmuls a whole 56x56x128 image
    #             is already only a few MB per step, so whole-image blocks are kept here.
    Nb, H, W, C = h1n.shape
    return pl.pallas_call(
        _conv3x3_bn_stats_kernel,
        out_shape=(jax.ShapeDtypeStruct((Nb, H, W, C), jnp.bfloat16),
                   jax.ShapeDtypeStruct((Nb * 8, C), jnp.float32)),
        grid=(Nb,),
        in_specs=[pl.BlockSpec((1, H, W, C), lambda n: (n, 0, 0, 0)),
                  pl.BlockSpec((1, C), lambda n: (0, 0)),
                  pl.BlockSpec((1, C), lambda n: (0, 0)),
                  pl.BlockSpec((9 * C, C), lambda n: (0, 0)),
                  pl.BlockSpec((1, C), lambda n: (0, 0))],
        out_specs=(pl.BlockSpec((1, H, W, C), lambda n: (n, 0, 0, 0)),
                   pl.BlockSpec((8, C), lambda n: (n, 0))),
        scratch_shapes=[pltpu.VMEM((H + 2, W + 2, C), jnp.bfloat16)],   # halo image
        compiler_params=pltpu.CompilerParams(
            dimension_semantics=("parallel",),         # per-step halo zero + partial stats
            vmem_limit_bytes=32 * 1024 * 1024),        # raise v5e's 16 MiB default scoped VMEM
    )(h1n, sc1, sh1, w2p, b2)


def bn_stats(x2d):
    M, C = x2d.shape
    tm = _tile_m(M)
    mt = M // tm
    return pl.pallas_call(
        _stats_kernel,
        out_shape=jax.ShapeDtypeStruct((mt * 8, C), jnp.float32),
        grid=(mt,),
        in_specs=[pl.BlockSpec((tm, C), lambda i: (i, 0))],
        out_specs=pl.BlockSpec((8, C), lambda i: (i, 0)),
        compiler_params=pltpu.CompilerParams(
            dimension_semantics=("parallel",)),
    )(x2d)


def bn_add_relu(h3, sc, sh, r2d):
    M, C = h3.shape
    tm = _tile_m(M)
    return pl.pallas_call(
        _bn_add_relu_kernel,
        out_shape=jax.ShapeDtypeStruct((M, C), jnp.float32),
        grid=(M // tm,),
        in_specs=[pl.BlockSpec((tm, C), lambda i: (i, 0)),
                  pl.BlockSpec((1, C), lambda i: (0, 0)),
                  pl.BlockSpec((1, C), lambda i: (0, 0)),
                  pl.BlockSpec((tm, C), lambda i: (i, 0))],
        out_specs=pl.BlockSpec((tm, C), lambda i: (i, 0)),
        compiler_params=pltpu.CompilerParams(
            dimension_semantics=("parallel",)),
    )(h3, sc, sh, r2d)


def bn_shortcut_relu(h3, sc, sh, xs2d, w_sc):
    M, C = h3.shape
    K = xs2d.shape[1]
    tm = _tile_m(M)
    return pl.pallas_call(
        _bn_mm_shortcut_relu_kernel,
        out_shape=jax.ShapeDtypeStruct((M, C), jnp.float32),
        grid=(M // tm,),
        in_specs=[pl.BlockSpec((tm, C), lambda i: (i, 0)),
                  pl.BlockSpec((1, C), lambda i: (0, 0)),
                  pl.BlockSpec((1, C), lambda i: (0, 0)),
                  pl.BlockSpec((tm, K), lambda i: (i, 0)),
                  pl.BlockSpec((K, C), lambda i: (0, 0))],
        out_specs=pl.BlockSpec((tm, C), lambda i: (i, 0)),
        compiler_params=pltpu.CompilerParams(
            dimension_semantics=("parallel",)),
    )(h3, sc, sh, xs2d, w_sc)


# --------------------------------------------------------------- full block

def bottleneck_forward(x_nchw, packed, half_res):
    """Forward pass of BottleneckBlock. Input/output are NCHW (PyTorch layout)."""
    x = jnp.transpose(x_nchw, (0, 2, 3, 1)).astype(jnp.bfloat16)      # -> NHWC, bf16 once
    Nb, H, W, Cin = x.shape
    stride = 2 if half_res else 1
    cb_p = packed["w1"].shape[1]
    cout_p = packed["w3"].shape[1]
    Cout = packed["outdim"]

    if packed["w_sc"] is None and stride != 1:
        # Ill-defined in the source PyTorch module too (spatial shape mismatch on the add).
        raise ValueError("identity shortcut with half_res=True is not supported")

    x2d = x.reshape(-1, Cin)
    M = x2d.shape[0]

    # Stage A: C1 (1x1) + per-tile partial BN1 stats (parallel grid)
    h1, st1 = matmul_stats(x2d, packed["w1"])
    s1, q1 = _combine_stats(st1, cb_p)
    sc1, sh1 = bn_scale_shift(s1, q1, M, packed["bn1_g"], packed["bn1_b"])

    # Stage B: BN1+ReLU prologue -> 3x3 conv (row-group matmuls) + per-image partial BN2 stats
    h1n = h1.reshape(Nb, H, W, cb_p)
    h2, st2 = conv3x3_bn_relu_stats(h1n, sc1, sh1, packed["w2"], packed["b2"])
    if stride == 2:
        # TODO(synk): compute the stride-2 taps in-kernel (strided pl.ds reads of the halo
        #             scratch) to save 4x conv FLOPs and the full-res bf16 h2 HBM round trip.
        h2 = h2[:, ::2, ::2, :]
        h2f = h2.reshape(-1, cb_p)
        st2 = bn_stats(h2f)          # BN2 stats must be over the strided conv output
    else:
        h2f = h2.reshape(-1, cb_p)
    M2 = h2f.shape[0]
    s2, q2 = _combine_stats(st2, cb_p)
    sc2, sh2 = bn_scale_shift(s2, q2, M2, packed["bn2_g"], packed["bn2_b"])

    # Stage C: BN2+ReLU prologue -> C3 (1x1) + per-tile partial BN3 stats
    h3, st3 = bn_relu_matmul_stats(h2f, sc2, sh2, packed["w3"])
    s3, q3 = _combine_stats(st3, cout_p)
    sc3, sh3 = bn_scale_shift(s3, q3, M2, packed["bn3_g"], packed["bn3_b"])

    # Stage D: BN3 + residual + ReLU (1x1 shortcut matmul fused into the kernel)
    if packed["w_sc"] is None:
        # Real ResNet identity widths are multiples of 128 -> the pad below is a no-op there;
        # the toy Cin=32 case pads a bf16 slab once in the wrapper (half the bytes of before).
        r2d = x2d if Cin == cout_p else jnp.pad(x2d, ((0, 0), (0, cout_p - Cin)))
        out2d = bn_add_relu(h3, sc3, sh3, r2d)
    else:
        xs2d = x[:, ::stride, ::stride, :].reshape(-1, Cin)
        out2d = bn_shortcut_relu(h3, sc3, sh3, xs2d, packed["w_sc"])

    Ho, Wo = H // stride, W // stride
    out = out2d.reshape(Nb, Ho, Wo, cout_p)[..., :Cout]
    return jnp.transpose(out, (0, 3, 1, 2)).astype(jnp.float32)       # -> NCHW


# ------------------------------------------------------------------- params

def init_params(key, indim, outdim):
    """Deterministic init mirroring init_layer (conv ~ N(0, sqrt(2/n)), BN gamma=1, beta=0)."""
    Cb = outdim // 4
    k1, k2, k3, k4, k5 = jax.random.split(key, 5)

    def conv_w(k, shape_oihw):
        o, _, kh, kw = shape_oihw
        std = math.sqrt(2.0 / float(kh * kw * o))
        return std * jax.random.normal(k, shape_oihw, jnp.float32)

    w1 = conv_w(k1, (Cb, indim, 1, 1))
    w2 = conv_w(k2, (Cb, Cb, 3, 3))
    w3 = conv_w(k3, (outdim, Cb, 1, 1))
    bound = 1.0 / math.sqrt(Cb * 9)                                   # C2 has bias=True
    b2 = jax.random.uniform(k4, (Cb,), jnp.float32, -bound, bound)

    params = {
        "w1": w1[:, :, 0, 0].T,                                       # (indim, Cb)
        "w2": jnp.transpose(w2, (2, 3, 1, 0)).reshape(9, Cb, Cb),     # tap-major (dy*3+dx)
        "b2": b2.reshape(1, Cb),
        "w3": w3[:, :, 0, 0].T,                                       # (Cb, outdim)
        "bn1_g": jnp.ones((Cb,), jnp.float32), "bn1_b": jnp.zeros((Cb,), jnp.float32),
        "bn2_g": jnp.ones((Cb,), jnp.float32), "bn2_b": jnp.zeros((Cb,), jnp.float32),
        "bn3_g": jnp.ones((outdim,), jnp.float32), "bn3_b": jnp.zeros((outdim,), jnp.float32),
    }
    if indim != outdim:
        wsc = conv_w(k5, (outdim, indim, 1, 1))
        params["w_sc"] = wsc[:, :, 0, 0].T                            # (indim, outdim)
    else:
        params["w_sc"] = None
    return params


def pack_params(params):
    """One-time packing: pad output-channel dims to multiples of 128 (lane-dense slabs),
    cast matmul weights to bf16; BN params / bias padded so padded channels stay zero."""
    indim, Cb = params["w1"].shape
    outdim = params["w3"].shape[1]
    cb_p, cout_p = _pad_to_128(Cb), _pad_to_128(outdim)

    def pad2(w, r, c):
        out = jnp.zeros((r, c), jnp.float32)
        return out.at[:w.shape[0], :w.shape[1]].set(w)

    w2 = jnp.zeros((9, cb_p, cb_p), jnp.float32).at[:, :Cb, :Cb].set(params["w2"])
    packed = {
        "outdim": int(outdim),
        "w1": pad2(params["w1"], indim, cb_p).astype(jnp.bfloat16),          # (indim, cb_p)
        "w2": w2.reshape(9 * cb_p, cb_p).astype(jnp.bfloat16),               # (9*cb_p, cb_p)
        "b2": jnp.zeros((1, cb_p), jnp.float32).at[0, :Cb].set(params["b2"][0]),
        "w3": pad2(params["w3"], cb_p, cout_p).astype(jnp.bfloat16),         # (cb_p, cout_p)
        "w_sc": (pad2(params["w_sc"], indim, cout_p).astype(jnp.bfloat16)
                 if params["w_sc"] is not None else None),
    }

    def padv(v, n, fill):
        return jnp.full((n,), fill, jnp.float32).at[:v.shape[0]].set(v)

    packed["bn1_g"] = padv(params["bn1_g"], cb_p, 1.0)
    packed["bn1_b"] = padv(params["bn1_b"], cb_p, 0.0)
    packed["bn2_g"] = padv(params["bn2_g"], cb_p, 1.0)
    packed["bn2_b"] = padv(params["bn2_b"], cb_p, 0.0)
    packed["bn3_g"] = padv(params["bn3_g"], cout_p, 1.0)
    packed["bn3_b"] = padv(params["bn3_b"], cout_p, 0.0)
    return packed


# --------------------------------------------------------------- pure-JAX ref

def reference_forward(x_nchw, params, half_res):
    x = jnp.transpose(x_nchw, (0, 2, 3, 1)).astype(jnp.float32)
    stride = 2 if half_res else 1

    def bn(h):
        mean = h.mean(axis=(0, 1, 2))
        var = ((h - mean) ** 2).mean(axis=(0, 1, 2))
        return (h - mean) / jnp.sqrt(var + 1e-5)

    h = jnp.einsum("nhwc,cd->nhwd", x, params["w1"], precision="highest")
    h = jax.nn.relu(bn(h))
    H, W = h.shape[1], h.shape[2]
    xp = jnp.pad(h, ((0, 0), (1, 1), (1, 1), (0, 0)))
    acc = 0.0
    for dy in range(3):
        for dx in range(3):
            acc = acc + jnp.einsum("nhwc,cd->nhwd",
                                   xp[:, dy:dy + H, dx:dx + W, :],
                                   params["w2"][dy * 3 + dx],
                                   precision="highest")
    acc = acc + params["b2"][0]
    if stride == 2:
        acc = acc[:, ::2, ::2, :]
    h = jax.nn.relu(bn(acc))
    h = jnp.einsum("nhwc,cd->nhwd", h, params["w3"], precision="highest")
    h = bn(h)
    if params["w_sc"] is None:
        short = x
    else:
        short = jnp.einsum("nhwc,cd->nhwd", x[:, ::stride, ::stride, :],
                           params["w_sc"], precision="highest")
    out = jax.nn.relu(h + short)
    return jnp.transpose(out, (0, 3, 1, 2))


# --------------------------------------------------------------------- main

if __name__ == "__main__":
    key = jax.random.PRNGKey(0)
    kx, kp1, kp2, kp3, kx3 = jax.random.split(key, 5)

    N, indim, H, W = 2, 16, 16, 16
    outdim = 32                                        # bottleneckdim = 8
    x = jax.random.normal(kx, (N, indim, H, W), jnp.float32)   # NCHW input
    TOL = 1.5e-1                                       # bf16 MXU operands + bf16 inter-stage acts

    # Config 1: half_res=False (stride 1), 1x1 shortcut (indim != outdim)
    params = init_params(kp1, indim, outdim)
    out = jax.block_until_ready(bottleneck_forward(x, pack_params(params), half_res=False))
    assert out.shape == (N, outdim, H, W)
    err = float(jnp.max(jnp.abs(out - reference_forward(x, params, half_res=False))))
    assert err < TOL, f"mismatch vs reference (stride 1): {err}"

    # Config 2: half_res=True (stride 2), strided 1x1 shortcut
    params2 = init_params(kp2, indim, outdim)
    out2 = jax.block_until_ready(bottleneck_forward(x, pack_params(params2), half_res=True))
    assert out2.shape == (N, outdim, H // 2, W // 2)
    err2 = float(jnp.max(jnp.abs(out2 - reference_forward(x, params2, half_res=True))))
    assert err2 < TOL, f"mismatch vs reference (half_res): {err2}"

    # Config 3: identity shortcut (indim == outdim), stride 1
    params3 = init_params(kp3, outdim, outdim)
    x3 = jax.random.normal(kx3, (N, outdim, H, W), jnp.float32)
    out3 = jax.block_until_ready(bottleneck_forward(x3, pack_params(params3), half_res=False))
    assert out3.shape == (N, outdim, H, W)
    err3 = float(jnp.max(jnp.abs(out3 - reference_forward(x3, params3, half_res=False))))
    assert err3 < TOL, f"mismatch vs reference (identity): {err3}"

    print("KERNEL_OK")
</pallas_src>

<mosaic_0001>
module attributes {stable_mosaic.version = 11 : i64} {
  func.func @_mm_stats_kernel(%arg0: i32, %arg1: memref<256x16xbf16, #tpu.memory_space<vmem>>, %arg2: memref<16x128xbf16, #tpu.memory_space<vmem>>, %arg3: memref<256x128xbf16, #tpu.memory_space<vmem>>, %arg4: memref<8x128xf32, #tpu.memory_space<vmem>>) attributes {dimension_semantics = [#tpu.dimension_semantics<parallel>], iteration_bounds = array<i64: 2>, scalar_prefetch = 0 : i64, scratch_operands = 0 : i64, tpu.core_type = #tpu.core_type<tc>, window_params = [{transform_indices = @transform_0, window_bounds = array<i64: 256, 16>}, {pipeline_mode = #tpu.pipeline_mode<synchronous>, transform_indices = @transform_1, window_bounds = array<i64: 16, 128>}, {transform_indices = @transform_2, window_bounds = array<i64: 256, 128>}, {transform_indices = @transform_3, window_bounds = array<i64: 8, 128>}]} {
    %c0 = arith.constant 0 : index
    %c0_0 = arith.constant 0 : index
    %0 = vector.load %arg1[%c0, %c0_0] : memref<256x16xbf16, #tpu.memory_space<vmem>>, vector<256x16xbf16>
    %c0_1 = arith.constant 0 : index
    %c0_2 = arith.constant 0 : index
    %1 = vector.load %arg2[%c0_1, %c0_2] : memref<16x128xbf16, #tpu.memory_space<vmem>>, vector<16x128xbf16>
    %cst = arith.constant dense<0.000000e+00> : vector<256x128xf32>
    %2 = tpu.matmul %0, %1, %cst {dimension_numbers = #tpu.dot_dimension_numbers<[1], [0], [0], [1], [0, 0, 1, 1], [], []>} : vector<256x16xbf16>, vector<16x128xbf16>, vector<256x128xf32> -> vector<256x128xf32>
    %3 = arith.truncf %2 : vector<256x128xf32> to vector<256x128xbf16>
    %c0_3 = arith.constant 0 : index
    %c0_4 = arith.constant 0 : index
    %4 = vector.load %arg3[%c0_3, %c0_4] : memref<256x128xbf16, #tpu.memory_space<vmem>>, vector<256x128xbf16>
    tpu.vector_store %arg3[%c0_3, %c0_4], %3 {strides = array<i32>} : memref<256x128xbf16, #tpu.memory_space<vmem>>, vector<256x128xbf16>,
    %cst_5 = arith.constant dense<0.000000e+00> : vector<128xf32>
    %5 = vector.multi_reduction <add>, %2, %cst_5 [0] : vector<256x128xf32> to vector<128xf32>
    %6 = vector.shape_cast %5 : vector<128xf32> to vector<1x128xf32>
    %c0_6 = arith.constant 0 : index
    %c0_7 = arith.constant 0 : index
    %7 = vector.load %arg4[%c0_6, %c0_7] : memref<8x128xf32, #tpu.memory_space<vmem>>, vector<1x128xf32>
    tpu.vector_store %arg4[%c0_6, %c0_7], %6 {strides = array<i32>} : memref<8x128xf32, #tpu.memory_space<vmem>>, vector<1x128xf32>,
    %8 = arith.mulf %2, %2 : vector<256x128xf32>
    %cst_8 = arith.constant dense<0.000000e+00> : vector<128xf32>
    %9 = vector.multi_reduction <add>, %8, %cst_8 [0] : vector<256x128xf32> to vector<128xf32>
    %10 = vector.shape_cast %9 : vector<128xf32> to vector<1x128xf32>
    %c1 = arith.constant 1 : index
    %c0_9 = arith.constant 0 : index
    %11 = vector.load %arg4[%c1, %c0_9] : memref<8x128xf32, #tpu.memory_space<vmem>>, vector<1x128xf32>
    tpu.vector_store %arg4[%c1, %c0_9], %10 {strides = array<i32>} : memref<8x128xf32, #tpu.memory_space<vmem>>, vector<1x128xf32>,
    %cst_10 = arith.constant 0.000000e+00 : f32
    %12 = vector.broadcast %cst_10 : f32 to vector<6x128xf32>
    %c2 = arith.constant 2 : index
    %c0_11 = arith.constant 0 : index
    %13 = vector.load %arg4[%c2, %c0_11] : memref<8x128xf32, #tpu.memory_space<vmem>>, vector<6x128xf32>
    tpu.vector_store %arg4[%c2, %c0_11], %12 {strides = array<i32>} : memref<8x128xf32, #tpu.memory_space<vmem>>, vector<6x128xf32>,
    return
  }
  func.func @transform_0(%arg0: i32) -> (i32, i32) {
    %c0_i32 = arith.constant 0 : i32
    %c0_i32_0 = arith.constant 0 : i32
    return %arg0, %c0_i32 : i32, i32
  }
  func.func @transform_1(%arg0: i32) -> (i32, i32) {
    %c0_i32 = arith.constant 0 : i32
    %c0_i32_0 = arith.constant 0 : i32
    %c0_i32_1 = arith.constant 0 : i32
    return %c0_i32, %c0_i32_0 : i32, i32
  }
  func.func @transform_2(%arg0: i32) -> (i32, i32) {
    %c0_i32 = arith.constant 0 : i32
    %c0_i32_0 = arith.constant 0 : i32
    return %arg0, %c0_i32 : i32, i32
  }
  func.func @transform_3(%arg0: i32) -> (i32, i32) {
    %c0_i32 = arith.constant 0 : i32
    %c0_i32_0 = arith.constant 0 : i32
    return %arg0, %c0_i32 : i32, i32
  }
}

</mosaic_0001>

<bundles_post_ra>
// kernel: tpu_custom_call.1
= control target key start
LH: loop header
LB: loop body
LE: loop exit
PB: predicated region body
PF: predicated region fallthrough
CT: control target
= control target key end

     0   :  { %9 = vsyncpa [#allocation3], 0  ;;  %s1649_s0 = inlined_call_operand.vmem [shape: bf16[512,16], index: 0, kind: input, shape index: {}]   ;;  %s1650_s1 = inlined_call_operand.vmem [shape: bf16[16,128], index: 1, kind: input, shape index: {}]   ;;  %s1651_s2 = inlined_call_operand.hbm [shape: bf16[512,128], index: 2, kind: output, shape index: {0}]   ;;  %s1652_s3 = inlined_call_operand.hbm [shape: f32[16,128], index: 3, kind: output, shape index: {1}]  }
   0x1   :  { %11 = vsyncpa [#allocation3 + $0x1], 0 }
   0x2   :  { %12 = vsyncpa [#allocation5], 0 }
   0x3   :  { %14 = vsyncpa [#allocation5 + $0x1], 0  ;;  %s1355_s12 = smov 0   ;;  %s1357_s13 = smov 0  }
   0x4   :  { %s1359_s14 = smov 0   ;;  %s1361_s15 = smov 0  }
   0x5 LB: > { %s1376_s16 = sadd.s32 4294967295, %s1328_s15   ;;  %s909_s17 = sadd.s32 4294967294, %s1328_s15   ;;  %s1328_s15 = sphi %s1361_s15, %s1658_s15   ;;  %s1324_s14 = sphi %s1359_s14, %s1657_s14   ;;  %s1320_s13 = sphi %s1357_s13, %s1656_s13   ;;  %s1316_s12 = sphi %s1355_s12, %s1655_s12  }
   0x6   : > { %s1380_s18 = sadd.s32 1, %s1328_s15   ;;  %s74_s19 = sadd.s32 1, %s1324_s14 }
   0x7   : > { %s71_s20 = ssub.s32 %s1328_s15, %s1380_s18  ;;  %p84_p0 = scmp.ne.s32.totalorder %s1324_s14, %s1320_s13 }
   0x8   : > { %p72_p1 = scmp.eq.s32.totalorder %s71_s20, 0  ;;  %p85_p2 = scmp.eq.s32.totalorder %s1376_s16, 1 }
   0x9   : > { %p90_p3 = scmp.ne.s32.totalorder %s1320_s13, %s1316_s12  ;;  %p91_p4 = scmp.eq.s32.totalorder %s909_s17, 1 }
   0xa   : > { %s1391_s21 = scalar_select %p72_p1, %s1324_s14, %s74_s19  }
   0xb   : > { %p1393_p5 = por %p85_p2, %p84_p0  ;;  %p1397_p6 = por %p91_p4, %p90_p3 }
   0xc   : > { %p912_p7 = scmp.ge.s32.totalorder %s1328_s15, 1  ;;  %p147_p8 = scmp.lt.s32.totalorder %s1328_s15, 3 }
   0xe   : > { %p148_p9 = pnand %p912_p7, %p147_p8 }
   0xf   : > { %v1217_v0 = vld [vmem:[%s1650_s1] sm:$0xff] (!%p148_p9)   ;;  %s915_s26 = sshll.u32 (!%p148_p9), %s1376_s16, 5  ;;  %vm304_vm0 = vcmask (!%p148_p9), 130048   ;;  %s1445_s4 = sand.u32 (!%p148_p9), 1, %s1320_s13   ;;  %v1330_v17 = vmov (!%p148_p9), 0.0  }
  0x10   : > { %151 = sbr.rel (%p148_p9) target bundleno = 344 (0x158), region = 28  ;;  %p177_p10 = scmp.lt.s32.totalorder (!%p148_p9), %s915_s26, 63  ;;  %1134 = vmatprep.subr.bf16.mxu0 (!%p148_p9), %v1217_v0  ;;  %1168 = vmatprep.subr.bf16.mxu1 (!%p148_p9), %v1217_v0 }
  0x11   : > { %1135 = vmatpush3.bf16.msra.mxu0 (!%p148_p9), %v1217_v0  ;;  %1169 = vmatpush3.bf16.msra.mxu1 (!%p148_p9), %v1217_v0  ;;  %s914_s5 = sshll.u32 (!%p148_p9), %s1445_s4, 3  ;;  %s913_s7 = sshll.u32 (!%p148_p9), %s1445_s4, 7 }
  0x12   : > { %s1448_s6 = scalar_lea.vmem (!%p148_p9), [#allocation4], %s914_s5  ;;  %s1452_s8 = scalar_lea.vmem (!%p148_p9), [#allocation2], %s913_s7 }
  0x13   : > { %782 = vst [vmem:[%s1448_s6 + $0x2] sm:$0x3f] (!%p148_p9), %v1330_v17  ;;  %s1021_s9 = sshll.u32 (!%p148_p9), %s1376_s16, 11  ;;  %s802_s10 = sshll.u32 (!%p148_p9), %s1452_s8, 4  ;;  %s1524_s10 = int_to_ptr.vmem [resolvable:$true] %s802_s10 }
  0x14   : > { %s1522_s19 = scalar_lea.hbm (!%p148_p9), %s1651_s2, %s1021_s9  ;;  %s784_s20 = scalar_lea.sflag (!%p148_p9), [#allocation3], %s1445_s4 }
  0x15   : > { %s1234_s24 = scalar_lea.vmem (!%p148_p9), %s1524_s10, 2048  ;;  %s1331_s25 = smov (!%p148_p9), [#allocation2]  }
  0x16   : > { %p1235_p11 = scmp.ne.s32.totalorder (!%p148_p9), %s1524_s10, %s1234_s24 }
  0x17   : > { %s1660_s26 = smov (!%p177_p10, %s915_s26), 63 }
  0x18   : > { %s916_s27 = sshll.u32 %s1660_s26, 2  ;;  %p1236_p12 = pnand %p1235_p11, %p1393_p5 }
  0x19   : > { %s1410_s30 = scalar_lea.vmem %s1649_s0, %s916_s27  ;;  %s1238_s26 = sshll.u32 %s1331_s25, 4  ;;  %s1239_s26 = int_to_ptr.vmem [resolvable:$false] %s1238_s26 }
  0x1a   : > { %v1218_v1 = vld [vmem:[%s1410_s30] sm:$0xff]   ;;  %v1219_v2 = vld [vmem:[%s1410_s30 + $0x8] sm:$0xff]   ;;  %v1220_v3 = vld [vmem:[%s1410_s30 + $0x10] sm:$0xff]   ;;  %p1237_p13 = pneg %p1236_p12  ;;  %s1240_s27 = scalar_lea.vmem %s1239_s26, 4096 }
  0x1b   : > { %1136 = vmatprep.mubr.msk.bf16.mxu0 %vm304_vm0, %v1218_v1  ;;  %v1221_v4 = vld [vmem:[%s1410_s30 + $0x18] sm:$0xff]   ;;  %v1222_v5 = vld [vmem:[%s1410_s30 + $0x20] sm:$0xff]   ;;  %v1227_v7 = vld [vmem:[%s1410_s30 + $0x48] sm:$0xff]   ;;  %p1241_p0 = scmp.lt.s32.totalorder %s1524_s10, %s1239_s26  ;;  %p1242_p1 = scmp.lt.s32.totalorder %s1240_s27, %s1234_s24 }
  0x1c   : > { %1137 = vmatmul.mubr.msk.bf16.vlgmr.msra.gmra.mrb[0].mxu0 %vm304_vm0, %v1219_v2  ;;  %v1226_v6 = vld [vmem:[%s1410_s30 + $0x40] sm:$0xff]   ;;  %v1228_v8 = vld [vmem:[%s1410_s30 + $0x50] sm:$0xff]   ;;  %v1223_v9 = vld [vmem:[%s1410_s30 + $0x28] sm:$0xff]  }
  0x1d   : > { %1140 = vmatprep.mubr.msk.bf16.mxu0 %vm304_vm0, %v1220_v3  ;;  %1152 = vmatprep.mubr.msk.bf16.mxu1 %vm304_vm0, %v1226_v6  ;;  %v1229_v10 = vld [vmem:[%s1410_s30 + $0x58] sm:$0xff]   ;;  %v1224_v11 = vld [vmem:[%s1410_s30 + $0x30] sm:$0xff]   ;;  %v1230_v12 = vld [vmem:[%s1410_s30 + $0x60] sm:$0xff]   ;;  %p1243_p2 = por %p1242_p1, %p1241_p0 }
  0x1e   : > { %1153 = vmatmul.mubr.msk.bf16.vlgmr.msra.gmra.mrb[0].mxu1 %vm304_vm0, %v1227_v7  ;;  %v1225_v13 = vld [vmem:[%s1410_s30 + $0x38] sm:$0xff]   ;;  %v1231_v14 = vld [vmem:[%s1410_s30 + $0x68] sm:$0xff]   ;;  %v1232_v15 = vld [vmem:[%s1410_s30 + $0x70] sm:$0xff]  }
  0x1f   : > { %1156 = vmatprep.mubr.msk.bf16.mxu1 %vm304_vm0, %v1228_v8  ;;  %v1233_v16 = vld [vmem:[%s1410_s30 + $0x78] sm:$0xff]   ;;  %p1244_p3 = pnand %p1243_p2, %p1237_p13 }
  0x24   : > { %1141 = vmatmul.mubr.msk.bf16.gmra.mrb[4].mxu0 %vm304_vm0, %v1221_v4 }
  0x25   : > { %1144 = vmatprep.mubr.msk.bf16.mxu0 %vm304_vm0, %v1222_v5 }
  0x26   : > { %1157 = vmatmul.mubr.msk.bf16.gmra.mrb[4].mxu1 %vm304_vm0, %v1229_v10 }
  0x27   : > { %1160 = vmatprep.mubr.msk.bf16.mxu1 %vm304_vm0, %v1230_v12 }
  0x2c   : > { %1145 = vmatmul.mubr.msk.bf16.gmra.mrb[8].mxu0 %vm304_vm0, %v1223_v9 }
  0x2d   : > { %1148 = vmatprep.mubr.msk.bf16.mxu0 %vm304_vm0, %v1224_v11 }
  0x2e   : > { %1161 = vmatmul.mubr.msk.bf16.gmra.mrb[8].mxu1 %vm304_vm0, %v1231_v14 }
  0x2f   : > { %1164 = vmatprep.mubr.msk.bf16.mxu1 %vm304_vm0, %v1232_v15 }
  0x34   : > { %1149 = vmatmul.mubr.msk.bf16.gmra.mrb[12].mxu0 %vm304_vm0, %v1225_v13 }
  0x36   : > { %1165 = vmatmul.mubr.msk.bf16.gmra.mrb[12].mxu1 %vm304_vm0, %v1233_v16 }
  0xef   : > { %v1138_v18 = vpop.f32.mrb[0].mxu0 }
  0xf0   : > { %v387_v19 = vpop.f32.mrb[1].mxu0  ;;  %v714_v27 = vmul.f32 %v1138_v18, %v1138_v18 }
  0xf1   : > { %v1139_v20 = vpop.f32.mrb[2].mxu0  ;;  %v712_v23 = vmul.f32 %v387_v19, %v387_v19  ;;  %v1456_v34 = vpop.f32.mrb[0].mxu1 }
  0xf2   : > { %v1030_v21 = vpack.c.bf16 %v1139_v20, %v1138_v18  ;;  %v390_v22 = vpop.f32.mrb[3].mxu0  ;;  %v715_v30 = vmul.f32 %v1139_v20, %v1139_v20  ;;  %v1458_v36 = vpop.f32.mrb[1].mxu1 }
  0xf3   : > { %v1025_v24 = vpack.c.bf16 %v390_v22, %v387_v19  ;;  %v674_v25 = vadd.f32 %v390_v22, %v387_v19  ;;  %v713_v26 = vmul.f32 %v390_v22, %v390_v22  ;;  %v1460_v41 = vpop.f32.mrb[2].mxu1 }
  0xf4   : > { %1102 = vst [vmem:[%s1452_s8 + $0x8] sm:$0xff] %v1030_v21   ;;  %v1070_v44 = vpack.c.bf16 %v1460_v41, %v1456_v34  ;;  %v1464_v45 = vpop.f32.mrb[3].mxu1 }
  0xf5   : > { %1026 = vst [vmem:[%s1452_s8] sm:$0xff] %v1025_v24   ;;  %v675_v28 = vadd.f32 %v1138_v18, %v674_v25  ;;  %v744_v29 = vadd.f32 %v713_v26, %v712_v23  ;;  %v1065_v50 = vpack.c.bf16 %v1464_v45, %v1458_v36 }
  0xf6   : > { %1110 = vst [vmem:[%s1452_s8 + $0x48] sm:$0xff] %v1070_v44   ;;  %v728_v44 = vmul.f32 %v1458_v36, %v1458_v36 }
  0xf7   : > { %v745_v31 = vadd.f32 %v744_v29, %v714_v27  ;;  %v1142_v32 = vpop.f32.mrb[4].mxu0  ;;  %v676_v33 = vadd.f32 %v1139_v20, %v675_v28  ;;  %1109 = vst [vmem:[%s1452_s8 + $0x40] sm:$0xff] %v1065_v50  }
  0xf8   : > { %v403_v35 = vpop.f32.mrb[5].mxu0  ;;  %v718_v51 = vmul.f32 %v1142_v32, %v1142_v32 }
  0xf9   : > { %v677_v37 = vadd.f32 %v676_v33, %v403_v35  ;;  %v716_v38 = vmul.f32 %v403_v35, %v403_v35  ;;  %v746_v39 = vadd.f32 %v745_v31, %v715_v30  ;;  %v1143_v40 = vpop.f32.mrb[6].mxu0  ;;  %v1472_v58 = vpop.f32.mrb[4].mxu1 }
  0xfa   : > { %v1040_v42 = vpack.c.bf16 %v1143_v40, %v1142_v32  ;;  %v406_v43 = vpop.f32.mrb[7].mxu0  ;;  %v719_v54 = vmul.f32 %v1143_v40, %v1143_v40  ;;  %v1474_v60 = vpop.f32.mrb[5].mxu1 }
  0xfb   : > { %v747_v46 = vadd.f32 %v746_v39, %v716_v38  ;;  %v1035_v47 = vpack.c.bf16 %v406_v43, %v403_v35  ;;  %v678_v48 = vadd.f32 %v677_v37, %v406_v43  ;;  %v717_v49 = vmul.f32 %v406_v43, %v406_v43  ;;  %v1476_v1 = vpop.f32.mrb[6].mxu1 }
  0xfc   : > { %1104 = vst [vmem:[%s1452_s8 + $0x18] sm:$0xff] %v1040_v42   ;;  %v1080_v4 = vpack.c.bf16 %v1476_v1, %v1472_v58  ;;  %v1480_v5 = vpop.f32.mrb[7].mxu1 }
  0xfd   : > { %1103 = vst [vmem:[%s1452_s8 + $0x10] sm:$0xff] %v1035_v47   ;;  %v679_v52 = vadd.f32 %v1142_v32, %v678_v48  ;;  %v748_v53 = vadd.f32 %v747_v46, %v717_v49  ;;  %v1075_v10 = vpack.c.bf16 %v1480_v5, %v1474_v60 }
  0xfe   : > { %1112 = vst [vmem:[%s1452_s8 + $0x58] sm:$0xff] %v1080_v4  }
  0xff   : > { %v749_v55 = vadd.f32 %v748_v53, %v718_v51  ;;  %v1146_v56 = vpop.f32.mrb[8].mxu0  ;;  %v680_v57 = vadd.f32 %v1143_v40, %v679_v52  ;;  %1111 = vst [vmem:[%s1452_s8 + $0x50] sm:$0xff] %v1075_v10  }
 0x100   : > { %v419_v59 = vpop.f32.mrb[9].mxu0  ;;  %v722_v11 = vmul.f32 %v1146_v56, %v1146_v56 }
 0x101   : > { %v681_v61 = vadd.f32 %v680_v57, %v419_v59  ;;  %v720_v62 = vmul.f32 %v419_v59, %v419_v59  ;;  %v750_v63 = vadd.f32 %v749_v55, %v719_v54  ;;  %v1147_v0 = vpop.f32.mrb[10].mxu0  ;;  %v1488_v18 = vpop.f32.mrb[8].mxu1  ;;  %v729_v54 = vmul.f32 %v1464_v45, %v1464_v45 }
 0x102   : > { %v1050_v2 = vpack.c.bf16 %v1147_v0, %v1146_v56  ;;  %v422_v3 = vpop.f32.mrb[11].mxu0  ;;  %v723_v14 = vmul.f32 %v1147_v0, %v1147_v0  ;;  %v1490_v20 = vpop.f32.mrb[9].mxu1 }
 0x103   : > { %v751_v6 = vadd.f32 %v750_v63, %v720_v62  ;;  %v1045_v7 = vpack.c.bf16 %v422_v3, %v419_v59  ;;  %v682_v8 = vadd.f32 %v681_v61, %v422_v3  ;;  %v721_v9 = vmul.f32 %v422_v3, %v422_v3  ;;  %v1492_v25 = vpop.f32.mrb[10].mxu1 }
 0x104   : > { %1106 = vst [vmem:[%s1452_s8 + $0x28] sm:$0xff] %v1050_v2   ;;  %v1090_v28 = vpack.c.bf16 %v1492_v25, %v1488_v18  ;;  %v1496_v29 = vpop.f32.mrb[11].mxu1 }
 0x105   : > { %1105 = vst [vmem:[%s1452_s8 + $0x20] sm:$0xff] %v1045_v7   ;;  %v683_v12 = vadd.f32 %v1146_v56, %v682_v8  ;;  %v752_v13 = vadd.f32 %v751_v6, %v721_v9  ;;  %v1085_v35 = vpack.c.bf16 %v1496_v29, %v1490_v20  ;;  %v730_v56 = vmul.f32 %v1456_v34, %v1456_v34 }
 0x106   : > { %1114 = vst [vmem:[%s1452_s8 + $0x68] sm:$0xff] %v1090_v28  }
 0x107   : > { %v753_v15 = vadd.f32 %v752_v13, %v722_v11  ;;  %v1150_v16 = vpop.f32.mrb[12].mxu0  ;;  %v684_v17 = vadd.f32 %v1147_v0, %v683_v12  ;;  %1113 = vst [vmem:[%s1452_s8 + $0x60] sm:$0xff] %v1085_v35  }
 0x108   : > { %v435_v19 = vpop.f32.mrb[13].mxu0  ;;  %v726_v37 = vmul.f32 %v1150_v16, %v1150_v16 }
 0x109   : > { %v685_v21 = vadd.f32 %v684_v17, %v435_v19  ;;  %v724_v22 = vmul.f32 %v435_v19, %v435_v19  ;;  %v754_v23 = vadd.f32 %v753_v15, %v723_v14  ;;  %v1151_v24 = vpop.f32.mrb[14].mxu0  ;;  %v1506_v46 = vpop.f32.mrb[12].mxu1 }
 0x10a   : > { %v1060_v26 = vpack.c.bf16 %v1151_v24, %v1150_v16  ;;  %v438_v27 = vpop.f32.mrb[15].mxu0  ;;  %v727_v40 = vmul.f32 %v1151_v24, %v1151_v24  ;;  %v1510_v47 = vpop.f32.mrb[13].mxu1 }
 0x10b   : > { %v755_v30 = vadd.f32 %v754_v23, %v724_v22  ;;  %v1055_v31 = vpack.c.bf16 %v438_v27, %v435_v19  ;;  %v686_v32 = vadd.f32 %v685_v21, %v438_v27  ;;  %v725_v33 = vmul.f32 %v438_v27, %v438_v27  ;;  %v1513_v50 = vpop.f32.mrb[14].mxu1 }
 0x10c   : > { %1108 = vst [vmem:[%s1452_s8 + $0x38] sm:$0xff] %v1060_v26   ;;  %v1100_v51 = vpack.c.bf16 %v1513_v50, %v1506_v46  ;;  %v1517_v52 = vpop.f32.mrb[15].mxu1 }
 0x10d   : > { %1107 = vst [vmem:[%s1452_s8 + $0x30] sm:$0xff] %v1055_v31   ;;  %v687_v38 = vadd.f32 %v1150_v16, %v686_v32  ;;  %v756_v39 = vadd.f32 %v755_v30, %v725_v33  ;;  %v1095_v55 = vpack.c.bf16 %v1517_v52, %v1510_v47 }
 0x10e   : > { %1116 = vst [vmem:[%s1452_s8 + $0x78] sm:$0xff] %v1100_v51  }
 0x10f   : > { %v757_v42 = vadd.f32 %v756_v39, %v726_v37  ;;  %v688_v43 = vadd.f32 %v1151_v24, %v687_v38  ;;  %1115 = vst [vmem:[%s1452_s8 + $0x70] sm:$0xff] %v1095_v55  }
 0x111   : > { %v689_v48 = vadd.f32 %v688_v43, %v1458_v36  ;;  %v758_v49 = vadd.f32 %v757_v42, %v727_v40 }
 0x113   : > { %v759_v36 = vadd.f32 %v758_v49, %v728_v44  ;;  %v690_v53 = vadd.f32 %v689_v48, %v1464_v45 }
 0x115   : > { %v691_v57 = vadd.f32 %v1456_v34, %v690_v53  ;;  %v760_v59 = vadd.f32 %v759_v36, %v729_v54 }
 0x116   : > { %1247 = shalt.err (!%p1244_p3)
}
 0x117   : > { %s1248_s28 = scalar_lea.hbm %s1522_s19, 2048  ;;  %s1252_s5 = scalar_lea.hbm %s1651_s2, 4096 }
 0x118   : > { %p1249_p4 = scmp.ne.s32.totalorder %s1522_s19, %s1248_s28  ;;  %p1253_p9 = scmp.lt.u32.totalorder %s1522_s19, %s1651_s2 }
 0x119   : > { %p1254_p10 = scmp.lt.u32.totalorder %s1252_s5, %s1248_s28  ;;  %p1256_p12 = scmp.lt.u32.totalorder %s1248_s28, %s1522_s19 }
 0x11a   : > { %p1250_p7 = pnand %p1249_p4, %p1393_p5 }
 0x11b   : > { %p1255_p11 = por %p1254_p10, %p1253_p9 }
 0x11c   : > { %p1251_p8 = pneg %p1250_p7 }
 0x11d   : > { %p1257_p13 = por %p1256_p12, %p1255_p11 }
 0x11f   : > { %p1258_p0 = pnand %p1257_p13, %p1251_p8 }
 0x121   : > { %1261 = shalt.err (!%p1258_p0)
}
 0x122   : > { %s1332_s9 = smov 64   ;;  %s1333_s11 = smov 4   ;;  %v731_v34 = vmul.f32 %v1460_v41, %v1460_v41  ;;  %v761_v45 = vadd.f32 %v760_v59, %v730_v56  ;;  %v692_v61 = vadd.f32 %v1460_v41, %v691_v57  ;;  %v732_v62 = vmul.f32 %v1474_v60, %v1474_v60 }
 0x123   : > { %1170 = dma.vmem_to_hbm [thread:$0]  (%p1393_p5), %s1524_s10, 2048, %s1522_s19, %s784_s20, %s1332_s9, %s1332_s9, %s1333_s11   ;;  %v733_v4 = vmul.f32 %v1480_v5, %v1480_v5  ;;  %v734_v6 = vmul.f32 %v1472_v58, %v1472_v58  ;;  %v735_v41 = vmul.f32 %v1476_v1, %v1476_v1  ;;  %v737_v14 = vmul.f32 %v1496_v29, %v1496_v29 }
 0x124   : > { %v693_v63 = vadd.f32 %v692_v61, %v1474_v60  ;;  %v762_v0 = vadd.f32 %v761_v45, %v731_v34  ;;  %v736_v60 = vmul.f32 %v1490_v20, %v1490_v20  ;;  %v741_v26 = vmul.f32 %v1517_v52, %v1517_v52  ;;  %s986_s10 = sshll.u32 %s1376_s16, 7  ;;  %s818_s17 = sshll.u32 %s1448_s6, 4  ;;  %s1607_s17 = int_to_ptr.vmem [resolvable:$true] %s818_s17 }
 0x125   : > { %v743_v28 = vmul.f32 %v1513_v50, %v1513_v50  ;;  %s1605_s24 = scalar_lea.hbm %s1652_s3, %s986_s10  ;;  %s789_s25 = scalar_lea.sflag [#allocation5], %s1445_s4 }
 0x126   : > { %v763_v2 = vadd.f32 %v762_v0, %v732_v62  ;;  %v694_v3 = vadd.f32 %v693_v63, %v1480_v5  ;;  %s1262_s26 = scalar_lea.vmem %s1607_s17, 128  ;;  %s1334_s16 = smov [#allocation4]  }
 0x127   : > { %p1263_p1 = scmp.ne.s32.totalorder %s1607_s17, %s1262_s26  ;;  %s1266_s27 = sshll.u32 %s1334_s16, 4  ;;  %s1267_s27 = int_to_ptr.vmem [resolvable:$false] %s1266_s27 }
 0x128   : > { %v695_v7 = vadd.f32 %v1472_v58, %v694_v3  ;;  %v764_v8 = vadd.f32 %v763_v2, %v733_v4  ;;  %v738_v58 = vmul.f32 %v1488_v18, %v1488_v18  ;;  %s1268_s28 = scalar_lea.vmem %s1267_s27, 256  ;;  %p1269_p4 = scmp.lt.s32.totalorder %s1607_s17, %s1267_s27 }
 0x129   : > { %p1264_p2 = pnand %p1263_p1, %p1393_p5  ;;  %p1270_p7 = scmp.lt.s32.totalorder %s1268_s28, %s1262_s26 }
 0x12a   : > { %v765_v9 = vadd.f32 %v764_v8, %v734_v6  ;;  %v696_v10 = vadd.f32 %v1476_v1, %v695_v7  ;;  %v739_v1 = vmul.f32 %v1492_v25, %v1492_v25 }
 0x12b   : > { %p1265_p3 = pneg %p1264_p2  ;;  %p1271_p8 = por %p1270_p7, %p1269_p4 }
 0x12c   : > { %v697_v11 = vadd.f32 %v696_v10, %v1490_v20  ;;  %v766_v12 = vadd.f32 %v765_v9, %v735_v41  ;;  %v740_v20 = vmul.f32 %v1510_v47, %v1510_v47 }
 0x12d   : > { %p1272_p9 = pnand %p1271_p8, %p1265_p3 }
 0x12e   : > { %v767_v13 = vadd.f32 %v766_v12, %v736_v60  ;;  %v698_v5 = vadd.f32 %v697_v11, %v1496_v29 }
 0x130   : > { %v699_v15 = vadd.f32 %v1488_v18, %v698_v5  ;;  %v768_v16 = vadd.f32 %v767_v13, %v737_v14  ;;  %v742_v18 = vmul.f32 %v1506_v46, %v1506_v46 }
 0x132   : > { %v769_v17 = vadd.f32 %v768_v16, %v738_v58  ;;  %v700_v19 = vadd.f32 %v1492_v25, %v699_v15 }
 0x134   : > { %v701_v21 = vadd.f32 %v700_v19, %v1510_v47  ;;  %v770_v22 = vadd.f32 %v769_v17, %v739_v1 }
 0x136   : > { %v771_v23 = vadd.f32 %v770_v22, %v740_v20  ;;  %v702_v24 = vadd.f32 %v701_v21, %v1517_v52 }
 0x138   : > { %v703_v27 = vadd.f32 %v1506_v46, %v702_v24  ;;  %v772_v25 = vadd.f32 %v771_v23, %v741_v26 }
 0x13a   : > { %v704_v29 = vadd.f32 %v1513_v50, %v703_v27  ;;  %v773_v30 = vadd.f32 %v772_v25, %v742_v18 }
 0x13c   : > { %v705_v31 = vrot.slane %v704_v29, 4  ;;  %v774_v32 = vadd.f32 %v773_v30, %v743_v28 }
 0x13e   : > { %v706_v33 = vadd.f32 %v705_v31, %v704_v29  ;;  %v775_v35 = vrot.slane %v774_v32, 4 }
 0x140   : > { %v707_v37 = vrot.slane %v706_v33, 2  ;;  %v776_v38 = vadd.f32 %v775_v35, %v774_v32 }
 0x142   : > { %v708_v39 = vadd.f32 %v707_v37, %v706_v33  ;;  %v777_v40 = vrot.slane %v776_v38, 2 }
 0x144   : > { %v709_v42 = vrot.slane %v708_v39, 1  ;;  %v778_v43 = vadd.f32 %v777_v40, %v776_v38 }
 0x146   : > { %v710_v44 = vadd.f32 %v709_v42, %v708_v39  ;;  %v779_v46 = vrot.slane %v778_v43, 1 }
 0x148   : > { %711 = vst [vmem:[%s1448_s6] sm:$0x1] %v710_v44  ;;  %v780_v47 = vadd.f32 %v779_v46, %v778_v43 }
 0x14a   : > { %781 = vst [vmem:[%s1448_s6 + $0x1] sm:$0x1] %v780_v47 }
 0x14b   : > { %1275 = shalt.err (!%p1272_p9)
}
 0x14c   : > { %s1276_s4 = scalar_lea.hbm %s1605_s24, 128  ;;  %s1280_s30 = scalar_lea.hbm %s1652_s3, 256 }
 0x14d   : > { %p1277_p10 = scmp.ne.s32.totalorder %s1605_s24, %s1276_s4  ;;  %p1281_p13 = scmp.lt.u32.totalorder %s1605_s24, %s1652_s3 }
 0x14e   : > { %p1282_p0 = scmp.lt.u32.totalorder %s1280_s30, %s1276_s4  ;;  %p1284_p2 = scmp.lt.u32.totalorder %s1276_s4, %s1605_s24 }
 0x14f   : > { %p1278_p11 = pnand %p1277_p10, %p1393_p5 }
 0x150   : > { %p1283_p1 = por %p1282_p0, %p1281_p13 }
 0x151   : > { %p1279_p12 = pneg %p1278_p11 }
 0x152   : > { %p1285_p3 = por %p1284_p2, %p1283_p1 }
 0x154   : > { %p1286_p4 = pnand %p1285_p3, %p1279_p12 }
 0x156   : > { %1289 = shalt.err (!%p1286_p4)
}
 0x157   : > { %1171 = dma.vmem_to_hbm [thread:$0]  (%p1393_p5), %s1607_s17, 128, %s1605_s24, %s789_s25  }
 0x158 PF: > { %p1181_p7 = scmp.ge.s32.totalorder %s1328_s15, 2  ;;  %s830_s8 = sand.u32 1, %s1316_s12  }
 0x159   : > { %s831_s9 = scalar_lea.sflag [#allocation3], %s830_s8 }
 0x15a   : > { %p1175_p8 = pnand %p1181_p7, %p1397_p6 }
 0x15c   : > { %1307 = dma.done.wait (!%p1175_p8), %s831_s9, 2048  }
 0x15d   : > { %1309 = vsyncadd (!%p1175_p8), %s831_s9, 4294965248  ;;  %s840_s11 = scalar_lea.sflag [#allocation5], %s830_s8 }
 0x15e   : > { %1311 = dma.done.wait (!%p1175_p8), %s840_s11, 128  }
 0x15f   : > { %1313 = vsyncadd (!%p1175_p8), %s840_s11, 4294967168  ;;  %p17_p5 = scmp.ge.s32.totalorder %s1380_s18, 4   ;;  %s1655_s12 = smov %s1320_s13 }
 0x160   : > { %s1656_s13 = smov %s1324_s14  ;;  %s1657_s14 = smov %s1391_s21 }
 0x161   : > { %s1658_s15 = smov %s1380_s18  ;;  %19 = sbr.rel (!%p17_p5) target bundleno = 5 (0x5), region = 80 }
 0x168   :  { %845 = vsyncpa [#allocation3], 1 }
 0x169   :  { %847 = vsyncpa [#allocation3 + $0x1], 1 }
 0x16a   :  { %848 = vsyncpa [#allocation5], 1 }
 0x16b   :  { %850 = vsyncpa [#allocation5 + $0x1], 1 }

</bundles_post_ra>
